<compile_context>
chip_gen: v7x
topology: tpu7x:2x2x1
jax: 0.10.0
libtpu: 0.0.40
codegen_flags: <defaults>
</compile_context>

<pallas_src>
import functools

import jax
import jax.numpy as jnp
from jax.experimental import pallas as pl
from jax.experimental.pallas import tpu as pltpu


# ---------------------------------------------------------------------------
# Kernels
# ---------------------------------------------------------------------------

def _fused_mlp_kernel(x_ref, w_ref, b_ref, o_ref):
    """out = sigmoid(x @ W_fused + b_fused), single MXU dot."""
    x = x_ref[...].astype(w_ref.dtype)                 # f32 -> bf16 in-kernel
    out = jnp.dot(x, w_ref[...], preferred_element_type=jnp.float32)
    out = out + b_ref[...]
    # sigmoid(x) == 0.5 * tanh(0.5 * x) + 0.5  -> one EUP op, exact, f32.
    o_ref[...] = (0.5 * jnp.tanh(0.5 * out) + 0.5).astype(o_ref.dtype)


def _two_layer_mlp_kernel(x_ref, w1_ref, b1_ref, w2_ref, b2_ref, o_ref):
    """Non-fused variant (kept for validation / opt-out)."""
    x = x_ref[...].astype(w1_ref.dtype)
    h1 = jnp.dot(x, w1_ref[...], preferred_element_type=jnp.float32)
    h1 = h1 + b1_ref[...]
    out = jnp.dot(h1.astype(w2_ref.dtype), w2_ref[...],
                  preferred_element_type=jnp.float32)
    out = out + b2_ref[...]
    o_ref[...] = (0.5 * jnp.tanh(0.5 * out) + 0.5).astype(o_ref.dtype)


# ---------------------------------------------------------------------------
# Wrapper
# ---------------------------------------------------------------------------

def _round_up(n, m):
    return -(-n // m) * m


def prepare_params(w1, b1, w2, b2, *, fuse=True, compute_dtype=jnp.bfloat16):
    """One-time weight prep (hoisted out of the per-call path).

    torch.nn.Linear layout: w1 [H, F], b1 [H]; w2 [O, H], b2 [O].
    """
    if fuse:
        # Fuse the two bias-only Linears in f32, then cast the matmul weight.
        w_fused = (w1.T.astype(jnp.float32) @ w2.T.astype(jnp.float32))      # [F, O]
        b_fused = (b1.astype(jnp.float32) @ w2.T.astype(jnp.float32)
                   + b2.astype(jnp.float32))                                 # [O]
        return ("fused",
                w_fused.astype(compute_dtype),
                b_fused.reshape(1, -1).astype(jnp.float32))
    return ("two_layer",
            w1.T.astype(compute_dtype),                                      # [F, H]
            b1.reshape(1, -1).astype(jnp.float32),                           # [1, H]
            w2.T.astype(compute_dtype),                                      # [H, O]
            b2.reshape(1, -1).astype(jnp.float32))                           # [1, O]


def _choose_tile_b(B, requested=None):
    # Large batch tiles amortize the ~0.35us/step overhead; cap at 8192 rows
    # (f32 x tile + f32 16-wide out, double-buffered, stays ~3 MiB of VMEM).
    tile = requested if requested is not None else min(8192, _round_up(B, 8))
    tile = max(8, _round_up(tile, 8))
    tile = min(tile, _round_up(B, 8))
    return tile


def net_forward(x, params, *, tile_b=None):
    """Forward of Net: sigmoid((x @ W1^T + b1) @ W2^T + b2).  x: [B, F] f32."""
    kind = params[0]
    B, F = x.shape

    tb = _choose_tile_b(B, tile_b)
    B_pad = _round_up(B, tb)
    x_p = x if B_pad == B else jnp.pad(x, ((0, B_pad - B), (0, 0)))
    grid = (B_pad // tb,)

    if kind == "fused":
        _, w_f, b_f = params
        O = w_f.shape[1]
        kernel = _fused_mlp_kernel
        in_specs = [
            pl.BlockSpec((tb, F), lambda i: (i, 0)),     # x: tiled over batch
            pl.BlockSpec((F, O), lambda i: (0, 0)),      # VMEM-resident weight
            pl.BlockSpec((1, O), lambda i: (0, 0)),
        ]
        operands = (x_p, w_f, b_f)
    else:
        _, w1_p, b1_p, w2_p, b2_p = params
        H = w1_p.shape[1]
        O = w2_p.shape[1]
        kernel = _two_layer_mlp_kernel
        in_specs = [
            pl.BlockSpec((tb, F), lambda i: (i, 0)),
            pl.BlockSpec((F, H), lambda i: (0, 0)),
            pl.BlockSpec((1, H), lambda i: (0, 0)),
            pl.BlockSpec((H, O), lambda i: (0, 0)),
            pl.BlockSpec((1, O), lambda i: (0, 0)),
        ]
        operands = (x_p, w1_p, b1_p, w2_p, b2_p)

    y_pad = pl.pallas_call(
        kernel,
        out_shape=jax.ShapeDtypeStruct((B_pad, O), jnp.float32),
        grid=grid,
        in_specs=in_specs,
        # Last block dim == full array dim (O), so no 128-padding is needed.
        out_specs=pl.BlockSpec((tb, O), lambda i: (i, 0)),
        compiler_params=pltpu.CompilerParams(
            dimension_semantics=("parallel",),
        ),
    )(*operands)

    return y_pad if B_pad == B else y_pad[:B]


# ---------------------------------------------------------------------------
# References
# ---------------------------------------------------------------------------

def reference_forward_f32(x, w1, b1, w2, b2):
    h1 = x @ w1.T + b1
    out = h1 @ w2.T + b2
    return jax.nn.sigmoid(out)


def reference_forward_matched_fused(x, w1, b1, w2, b2, compute_dtype=jnp.bfloat16):
    """Same fused-weight / bf16-input / f32-accumulate recipe as the kernel."""
    w_f = (w1.T @ w2.T).astype(compute_dtype)
    b_f = b1 @ w2.T + b2
    out = jnp.dot(x.astype(compute_dtype), w_f,
                  preferred_element_type=jnp.float32) + b_f
    return jax.nn.sigmoid(out)


# ---------------------------------------------------------------------------
# Main
# ---------------------------------------------------------------------------

if __name__ == "__main__":
    # Shapes consistent with the module: n_feature=32, n_hidden1=64, n_output=16.
    B, n_feature, n_hidden1, n_output = 8, 32, 64, 16

    key = jax.random.PRNGKey(0)
    kx, kw1, kb1, kw2, kb2 = jax.random.split(key, 5)

    x = jax.random.normal(kx, (B, n_feature), dtype=jnp.float32)

    # torch.nn.Linear layout: weight [out, in], bias [out].
    w1 = jax.random.normal(kw1, (n_hidden1, n_feature), dtype=jnp.float32) * 0.1
    b1 = jax.random.normal(kb1, (n_hidden1,), dtype=jnp.float32) * 0.1
    w2 = jax.random.normal(kw2, (n_output, n_hidden1), dtype=jnp.float32) * 0.1
    b2 = jax.random.normal(kb2, (n_output,), dtype=jnp.float32) * 0.1

    # Fused (default, fastest) path.
    params_fused = prepare_params(w1, b1, w2, b2, fuse=True)
    fwd = jax.jit(functools.partial(net_forward, params=params_fused))
    y = fwd(x)
    jax.block_until_ready(y)
    assert y.shape == (B, n_output)

    # Non-fused two-dot path (cross-check).
    params_two = prepare_params(w1, b1, w2, b2, fuse=False)
    y_two = net_forward(x, params_two)
    jax.block_until_ready(y_two)

    y_matched = reference_forward_matched_fused(x, w1, b1, w2, b2)
    y_f32 = reference_forward_f32(x, w1, b1, w2, b2)

    # Tight check vs a reference using the identical fused-bf16/f32 recipe.
    assert jnp.allclose(y, y_matched, atol=2e-3, rtol=2e-3), float(
        jnp.max(jnp.abs(y - y_matched)))
    # Both kernel paths vs the pure-f32 PyTorch-equivalent math.
    assert jnp.allclose(y, y_f32, atol=2e-2, rtol=2e-2), float(
        jnp.max(jnp.abs(y - y_f32)))
    assert jnp.allclose(y_two, y_f32, atol=2e-2, rtol=2e-2), float(
        jnp.max(jnp.abs(y_two - y_f32)))

    print("KERNEL_OK")
</pallas_src>

<mosaic_0001>
module attributes {stable_mosaic.version = 11 : i64} {
  func.func @_fused_mlp_kernel(%arg0: i32, %arg1: memref<8x32xf32, #tpu.memory_space<vmem>>, %arg2: memref<32x16xbf16, #tpu.memory_space<vmem>>, %arg3: memref<1x16xf32, #tpu.memory_space<vmem>>, %arg4: memref<8x16xf32, #tpu.memory_space<vmem>>) attributes {dimension_semantics = [#tpu.dimension_semantics<parallel>], iteration_bounds = array<i64: 1>, scalar_prefetch = 0 : i64, scratch_operands = 0 : i64, tpu.core_type = #tpu.core_type<tc>, window_params = [{transform_indices = @transform_0, window_bounds = array<i64: 8, 32>}, {pipeline_mode = #tpu.pipeline_mode<synchronous>, transform_indices = @transform_1, window_bounds = array<i64: 32, 16>}, {pipeline_mode = #tpu.pipeline_mode<synchronous>, transform_indices = @transform_2, window_bounds = array<i64: 1, 16>}, {transform_indices = @transform_3, window_bounds = array<i64: 8, 16>}]} {
    %c0 = arith.constant 0 : index
    %c0_0 = arith.constant 0 : index
    %0 = vector.load %arg1[%c0, %c0_0] : memref<8x32xf32, #tpu.memory_space<vmem>>, vector<8x32xf32>
    %1 = arith.truncf %0 : vector<8x32xf32> to vector<8x32xbf16>
    %c0_1 = arith.constant 0 : index
    %c0_2 = arith.constant 0 : index
    %2 = vector.load %arg2[%c0_1, %c0_2] : memref<32x16xbf16, #tpu.memory_space<vmem>>, vector<32x16xbf16>
    %cst = arith.constant dense<0.000000e+00> : vector<8x16xf32>
    %3 = tpu.matmul %1, %2, %cst {dimension_numbers = #tpu.dot_dimension_numbers<[1], [0], [0], [1], [0, 0, 1, 1], [], []>} : vector<8x32xbf16>, vector<32x16xbf16>, vector<8x16xf32> -> vector<8x16xf32>
    %c0_3 = arith.constant 0 : index
    %c0_4 = arith.constant 0 : index
    %4 = vector.load %arg3[%c0_3, %c0_4] : memref<1x16xf32, #tpu.memory_space<vmem>>, vector<1x16xf32>
    %5 = vector.broadcast %4 : vector<1x16xf32> to vector<8x16xf32>
    %6 = arith.addf %3, %5 : vector<8x16xf32>
    %cst_5 = arith.constant 5.000000e-01 : f32
    %7 = vector.broadcast %cst_5 : f32 to vector<8x16xf32>
    %8 = arith.mulf %7, %6 : vector<8x16xf32>
    %9 = math.tanh %8 : vector<8x16xf32>
    %cst_6 = arith.constant 5.000000e-01 : f32
    %10 = vector.broadcast %cst_6 : f32 to vector<8x16xf32>
    %11 = arith.mulf %10, %9 : vector<8x16xf32>
    %cst_7 = arith.constant 5.000000e-01 : f32
    %12 = vector.broadcast %cst_7 : f32 to vector<8x16xf32>
    %13 = arith.addf %11, %12 : vector<8x16xf32>
    %c0_8 = arith.constant 0 : index
    %c0_9 = arith.constant 0 : index
    %14 = vector.load %arg4[%c0_8, %c0_9] : memref<8x16xf32, #tpu.memory_space<vmem>>, vector<8x16xf32>
    tpu.vector_store %arg4[%c0_8, %c0_9], %13 {strides = array<i32>} : memref<8x16xf32, #tpu.memory_space<vmem>>, vector<8x16xf32>,
    return
  }
  func.func @transform_0(%arg0: i32) -> (i32, i32) {
    %c0_i32 = arith.constant 0 : i32
    %c0_i32_0 = arith.constant 0 : i32
    return %arg0, %c0_i32 : i32, i32
  }
  func.func @transform_1(%arg0: i32) -> (i32, i32) {
    %c0_i32 = arith.constant 0 : i32
    %c0_i32_0 = arith.constant 0 : i32
    %c0_i32_1 = arith.constant 0 : i32
    return %c0_i32, %c0_i32_0 : i32, i32
  }
  func.func @transform_2(%arg0: i32) -> (i32, i32) {
    %c0_i32 = arith.constant 0 : i32
    %c0_i32_0 = arith.constant 0 : i32
    %c0_i32_1 = arith.constant 0 : i32
    return %c0_i32, %c0_i32_0 : i32, i32
  }
  func.func @transform_3(%arg0: i32) -> (i32, i32) {
    %c0_i32 = arith.constant 0 : i32
    %c0_i32_0 = arith.constant 0 : i32
    return %arg0, %c0_i32 : i32, i32
  }
}

</mosaic_0001>

<bundles_post_ra>
// kernel: net_forward.1
= control target key start
LH: loop header
LB: loop body
LE: loop exit
PB: predicated region body
PF: predicated region fallthrough
CT: control target
= control target key end

     0   :  { %8 = vsyncpa [#allocation3], 0  ;;  %s304_s0 = inlined_call_operand.hbm [shape: f32[8,32], index: 0, kind: input, shape index: {}]   ;;  %s305_s1 = inlined_call_operand.hbm [shape: bf16[32,16], index: 1, kind: input, shape index: {}]   ;;  %s306_s2 = inlined_call_operand.vmem [shape: f32[1,16], index: 2, kind: input, shape index: {}]   ;;  %s307_s3 = inlined_call_operand.hbm [shape: f32[8,16], index: 3, kind: output, shape index: {}]  }
   0x1   :  { %9 = vsyncpa [#allocation6], 0 }
   0x2   :  { %10 = vsyncpa [#allocation4], 0  ;;  %s231_s12 = smov [#allocation2]   ;;  %s232_s14 = smov [#allocation5]  }
   0x3   :  { %s17_s13 = sshll.u32 %s231_s12, 4  ;;  %s26_s15 = sshll.u32 %s232_s14, 4  ;;  %s18_s13 = int_to_ptr.vmem [resolvable:$true] %s17_s13  ;;  %s258_s15 = int_to_ptr.vmem [resolvable:$true] %s26_s15 }
   0x4   :  { %s159_s18 = scalar_lea.hbm %s304_s0, 128 }
   0x5   :  { %p160_p0 = scmp.ne.s32.totalorder %s304_s0, %s159_s18  ;;  %p163_p1 = scmp.lt.u32.totalorder %s159_s18, %s304_s0 }
   0x7   :  { %p165_p2 = pnand %p163_p1, %p160_p0 }
   0x9   :  { %168 = shalt.err (!%p165_p2)
}
   0xa   :  { %s169_s23 = scalar_lea.vmem %s18_s13, 128  ;;  %p174_p4 = scmp.lt.s32.totalorder %s18_s13, %s18_s13 }
   0xb   :  { %p170_p3 = scmp.ne.s32.totalorder %s18_s13, %s169_s23  ;;  %p175_p5 = scmp.lt.s32.totalorder %s169_s23, %s169_s23 }
   0xd   :  { %p176_p6 = por %p175_p5, %p174_p4 }
   0xf   :  { %p177_p7 = pnand %p176_p6, %p170_p3 }
  0x11   :  { %180 = shalt.err (!%p177_p7)
}
  0x12   :  { %20 = dma.hbm_to_vmem [thread:$0]  %s304_s0, 128, %s18_s13, [#allocation3]  }
  0x13   :  { %s181_s28 = scalar_lea.hbm %s305_s1, 256 }
  0x14   :  { %p182_p8 = scmp.ne.s32.totalorder %s305_s1, %s181_s28  ;;  %p185_p9 = scmp.lt.u32.totalorder %s181_s28, %s305_s1 }
  0x16   :  { %p187_p10 = pnand %p185_p9, %p182_p8 }
  0x18   :  { %190 = shalt.err (!%p187_p10)
}
  0x19   :  { %s191_s6 = scalar_lea.vmem %s258_s15, 256  ;;  %p196_p12 = scmp.lt.s32.totalorder %s258_s15, %s258_s15 }
  0x1a   :  { %p192_p11 = scmp.ne.s32.totalorder %s258_s15, %s191_s6  ;;  %p197_p13 = scmp.lt.s32.totalorder %s191_s6, %s191_s6 }
  0x1c   :  { %p198_p0 = por %p197_p13, %p196_p12 }
  0x1e   :  { %p199_p1 = pnand %p198_p0, %p192_p11 }
  0x20   :  { %202 = shalt.err (!%p199_p1)
}
  0x21   :  { %s233_s0 = smov 64   ;;  %s234_s7 = smov 4  }
  0x22   :  { %32 = dma.hbm_to_vmem [thread:$0]  %s305_s1, 256, %s258_s15, [#allocation6], %s233_s0, %s233_s0, %s234_s7  }
  0x23   :  { %225 = dma.done.wait [#allocation3], 128  }
  0x24   :  { %226 = vsyncadd [#allocation3], 4294967168 }
  0x25   :  { %227 = dma.done.wait [#allocation6], 256  }
  0x26   :  { %228 = vsyncadd [#allocation6], 4294967040  ;;  %v235_v0 = vmov 0.0   ;;  %vm236_vm0 = vmmov 0   ;;  %v155_v1 = vld [vmem:[#allocation5] sm:$0xff]   ;;  %v156_v2 = vld [vmem:[#allocation5 + $0x8] sm:$0xff]  }
  0x27   :  { %140 = vmatprep.subr.bf16.mxu0 %v235_v0  ;;  %144 = vmatprep.mubr.msk.bf16.mxu0 %vm236_vm0, %v235_v0  ;;  %v42_v3 = vld [vmem:[#allocation2] sm:$0xff]  ;;  %vm67_vm1 = vcmask 261120   ;;  %s237_s1 = smov [#allocation7]   ;;  %vm115_vm2 = vcmask 130048  }
  0x28   :  { %141 = vmatpush3.bf16.msra.mxu0 %v155_v1  ;;  %v43_v4 = vpack.c.bf16 %v42_v3, %v42_v3  ;;  %v133_v5 = vld [vmem:[%s306_s2] ss:$0 sm:$0xff]  ;;  %s123_s12 = sshll.u32 %s237_s1, 4  ;;  %s124_s12 = int_to_ptr.vmem [resolvable:$true] %s123_s12 }
  0x29   :  { %142 = vmatprep.subr.bf16.mxu0 %v235_v0  ;;  %s203_s13 = scalar_lea.vmem %s124_s12, 128  ;;  %p208_p3 = scmp.lt.s32.totalorder %s124_s12, %s124_s12 }
  0x2a   :  { %p204_p2 = scmp.ne.s32.totalorder %s124_s12, %s203_s13  ;;  %p209_p4 = scmp.lt.s32.totalorder %s203_s13, %s203_s13 }
  0x2c   :  { %143 = vmatpush3.bf16.msra.mxu0 %v156_v2  ;;  %p210_p5 = por %p209_p4, %p208_p3 }
  0x2e   :  { %p211_p6 = pnand %p210_p5, %p204_p2 }
  0x2f   :  { %145 = vmatmul.mubr.msk.bf16.vlgmr.msra.gmra.mrb[0].mxu0 %vm67_vm1, %v43_v4 }
 0x102   :  { %v105_v6 = vpop.f32.mrb[0].mxu0 }
 0x103   :  { %v106_v7 = vadd.f32 %v133_v5, %v105_v6  ;;  %v146_v8 = vpop.f32.mrb[1].mxu0 }
 0x104   :  { %v108_v9 = vpop.f32.mrb[2].mxu0 }
 0x105   :  { %v111_v10 = vmul.f32 0.5, %v106_v7  ;;  %v147_v11 = vpop.f32.mrb[3].mxu0 }
 0x107   :  { %157 = vtanh.f32 %v111_v10 }
 0x111   :  { %v158_v12 = vpop.eup %157 }
 0x112   :  { %v113_v13 = vmul.f32 0.5, %v158_v12 }
 0x114   :  { %v114_v14 = vadd.f32 0.5, %v113_v13 }
 0x116   :  { %116 = vst.msk [vmem:[#allocation7] sm:$0xff] %vm115_vm2, %v114_v14 }
 0x117   :  { %214 = shalt.err (!%p211_p6)
}
 0x118   :  { %s215_s15 = scalar_lea.hbm %s307_s3, 128 }
 0x119   :  { %p216_p7 = scmp.ne.s32.totalorder %s307_s3, %s215_s15  ;;  %p219_p8 = scmp.lt.u32.totalorder %s215_s15, %s307_s3 }
 0x11b   :  { %p221_p9 = pnand %p219_p8, %p216_p7 }
 0x11d   :  { %224 = shalt.err (!%p221_p9)
}
 0x11e   :  { %126 = dma.vmem_to_hbm [thread:$0]  %s124_s12, 128, %s307_s3, [#allocation4]  }
 0x11f   :  { %229 = dma.done.wait [#allocation4], 128  }
 0x120   :  { %230 = vsyncadd [#allocation4], 4294967168 }
 0x121   :  { %130 = vsyncpa [#allocation3], 1 }
 0x122   :  { %131 = vsyncpa [#allocation6], 1 }
 0x123   :  { %132 = vsyncpa [#allocation4], 1 }

</bundles_post_ra>
